<compile_context>
chip_gen: v7x
topology: tpu7x:2x2x1
jax: 0.10.0
libtpu: 0.0.40
codegen_flags: <defaults>
</compile_context>

<pallas_src>
import functools

import jax
import jax.numpy as jnp
from jax import lax
from jax.experimental import pallas as pl
from jax.experimental.pallas import tpu as pltpu


def _gqa_kernel(x_ref, wqkv_ref, bqkv_ref, wo_ref, bo_ref, o_ref,
                attn_ref, qstk_ref, k_ref, v_ref, *,
                seq, num_heads, num_kv_heads, head_dim):
    n_rep = num_heads // num_kv_heads
    q_dim = num_heads * head_dim
    kv_dim = num_kv_heads * head_dim

    # ---- fused QKV projection: one bf16 MXU matmul for this batch tile ----
    x_bf = x_ref[0].astype(jnp.bfloat16)                        # (S, H)
    qkv = jnp.dot(x_bf, wqkv_ref[...],
                  preferred_element_type=jnp.float32) + bqkv_ref[...]
    q = qkv[:, :q_dim]                                          # (S, q_dim) f32, pre-scaled
    # Stage K / V as bf16 scratch: bounds live ranges, MXU consumes bf16.
    k_ref[...] = qkv[:, q_dim:q_dim + kv_dim].astype(jnp.bfloat16)
    v_ref[...] = qkv[:, q_dim + kv_dim:].astype(jnp.bfloat16)

    # ---- causal mask for the rep-stacked score matrix (row = rep*S + qpos) -
    qpos = lax.broadcasted_iota(
        jnp.int32, (n_rep, seq, seq), 1).reshape(n_rep * seq, seq)
    kpos = lax.broadcasted_iota(jnp.int32, (n_rep * seq, seq), 1)
    causal = qpos >= kpos
    neg_inf = jnp.float32(-1e30)

    # ---- attention: one scores / PV matmul per kv-head group --------------
    # The batch loop moved onto the "parallel" grid axis; num_kv_heads is a
    # small static constant so this unroll stays tiny.
    for g in range(num_kv_heads):
        # Stack this group's n_rep query heads along M via sublane stores
        # (no lane concatenation / XLU repacking).
        for r in range(n_rep):
            h = g * n_rep + r
            qstk_ref[r * seq:(r + 1) * seq, :] = (
                q[:, h * head_dim:(h + 1) * head_dim])
        qg = qstk_ref[...].astype(jnp.bfloat16)                 # (n_rep*S, hd)
        kg = k_ref[:, g * head_dim:(g + 1) * head_dim]          # (S, hd) bf16
        vg = v_ref[:, g * head_dim:(g + 1) * head_dim]          # (S, hd) bf16

        # Contract on the last dim of both operands -> no explicit transpose.
        s = lax.dot_general(qg, kg, (((1,), (1,)), ((), ())),
                            preferred_element_type=jnp.float32)  # (n_rep*S, S)
        s = jnp.where(causal, s, neg_inf)
        m = jnp.max(s, axis=-1, keepdims=True)
        p = jnp.exp(s - m)                                      # f32 numerator
        denom = jnp.sum(p, axis=-1, keepdims=True)

        # Deferred normalization: PV on unnormalized p, then scale the small
        # (n_rep*S, head_dim) result instead of the (n_rep*S, S) probabilities.
        og = jnp.dot(p.astype(jnp.bfloat16), vg,
                     preferred_element_type=jnp.float32)
        og = og * pl.reciprocal(denom, approx=True)             # EUP vrcp

        # Scatter group result into the bf16 per-batch attention slab.
        for r in range(n_rep):
            h = g * n_rep + r
            attn_ref[:, h * head_dim:(h + 1) * head_dim] = (
                og[r * seq:(r + 1) * seq, :].astype(jnp.bfloat16))

    # ---- output projection over this batch tile ----------------------------
    out = jnp.dot(attn_ref[...], wo_ref[...],
                  preferred_element_type=jnp.float32) + bo_ref[...]
    o_ref[0] = out.astype(o_ref.dtype)


def grouped_attention(x, params, *, num_heads, num_kv_heads):
    B, S, H = x.shape
    head_dim = H // num_heads
    n_rep = num_heads // num_kv_heads
    q_dim = num_heads * head_dim
    kv_dim = num_kv_heads * head_dim
    qkv_dim = q_dim + 2 * kv_dim

    wq, bq, wk, bk, wv, bv, wo, bo = params
    scale = 1.0 / (head_dim ** 0.5)

    # Fold the attention scale into the Q projection (free at wrapper time)
    # and fuse Q/K/V into one wide bf16 matmul operand.
    wqkv = jnp.concatenate([wq * scale, wk, wv], axis=1).astype(jnp.bfloat16)
    bqkv = jnp.concatenate([bq * scale, bk, bv], axis=1)         # f32
    wo_bf = wo.astype(jnp.bfloat16)

    kernel = functools.partial(
        _gqa_kernel, seq=S, num_heads=num_heads,
        num_kv_heads=num_kv_heads, head_dim=head_dim)

    def resident(shape):
        return pl.BlockSpec(shape, lambda b: (0,) * len(shape))

    flops = (2 * B * S * H * qkv_dim                 # fused QKV projection
             + 4 * B * num_heads * S * S * head_dim  # scores + PV matmuls
             + 2 * B * S * q_dim * H)                # output projection
    bytes_accessed = (4 * x.size + 2 * wqkv.size + 4 * bqkv.size
                      + 2 * wo_bf.size + 4 * bo.size + 4 * B * S * H)
    cost = pl.CostEstimate(flops=flops,
                           transcendentals=B * num_heads * S * S,
                           bytes_accessed=bytes_accessed)

    out = pl.pallas_call(
        kernel,
        out_shape=jax.ShapeDtypeStruct((B, S, H), x.dtype),
        grid=(B,),
        in_specs=[
            pl.BlockSpec((1, S, H), lambda b: (b, 0, 0)),        # per-batch x tile
            resident((H, qkv_dim)),                              # wqkv (resident)
            resident((1, qkv_dim)),                              # bqkv
            resident((q_dim, H)),                                # wo
            resident((1, H)),                                    # bo
        ],
        out_specs=pl.BlockSpec((1, S, H), lambda b: (b, 0, 0)),
        scratch_shapes=[
            pltpu.VMEM((S, q_dim), jnp.bfloat16),                # attention slab
            pltpu.VMEM((n_rep * S, head_dim), jnp.float32),      # rep-stacked Q
            pltpu.VMEM((S, kv_dim), jnp.bfloat16),               # K staging
            pltpu.VMEM((S, kv_dim), jnp.bfloat16),               # V staging
        ],
        compiler_params=pltpu.CompilerParams(
            dimension_semantics=("parallel",),
            vmem_limit_bytes=64 * 1024 * 1024),
        cost_estimate=cost,
    )(x, wqkv, bqkv, wo_bf, bo)
    return out


def _reference(x, params, *, num_heads, num_kv_heads):
    """Pure-JAX f32 reference mirroring the PyTorch forward."""
    B, S, H = x.shape
    hd = H // num_heads
    n_rep = num_heads // num_kv_heads
    wq, bq, wk, bk, wv, bv, wo, bo = params

    q = (x @ wq + bq[0]).reshape(B, S, num_heads, hd).transpose(0, 2, 1, 3)
    k = (x @ wk + bk[0]).reshape(B, S, num_kv_heads, hd).transpose(0, 2, 1, 3)
    v = (x @ wv + bv[0]).reshape(B, S, num_kv_heads, hd).transpose(0, 2, 1, 3)
    k = jnp.repeat(k, n_rep, axis=1)
    v = jnp.repeat(v, n_rep, axis=1)

    scale = 1.0 / (hd ** 0.5)
    scores = jnp.einsum("bhqd,bhkd->bhqk", q, k) * scale
    mask = jnp.tril(jnp.ones((S, S), dtype=bool))
    scores = jnp.where(mask, scores, -1e30)
    probs = jax.nn.softmax(scores, axis=-1)
    attn = jnp.einsum("bhqk,bhkd->bhqd", probs, v)
    attn = attn.transpose(0, 2, 1, 3).reshape(B, S, H)
    return attn @ wo + bo[0]


if __name__ == "__main__":
    # Small, forward-consistent shapes.
    B, S, H = 2, 8, 32
    NUM_HEADS, NUM_KV_HEADS = 4, 2
    HD = H // NUM_HEADS
    Q_DIM = NUM_HEADS * HD
    KV_DIM = NUM_KV_HEADS * HD

    key = jax.random.PRNGKey(0)
    ks = jax.random.split(key, 9)
    w_scale = 0.05
    x = jax.random.normal(ks[0], (B, S, H), dtype=jnp.float32)
    params = (
        w_scale * jax.random.normal(ks[1], (H, Q_DIM), dtype=jnp.float32),
        w_scale * jax.random.normal(ks[2], (1, Q_DIM), dtype=jnp.float32),
        w_scale * jax.random.normal(ks[3], (H, KV_DIM), dtype=jnp.float32),
        w_scale * jax.random.normal(ks[4], (1, KV_DIM), dtype=jnp.float32),
        w_scale * jax.random.normal(ks[5], (H, KV_DIM), dtype=jnp.float32),
        w_scale * jax.random.normal(ks[6], (1, KV_DIM), dtype=jnp.float32),
        w_scale * jax.random.normal(ks[7], (Q_DIM, H), dtype=jnp.float32),
        w_scale * jax.random.normal(ks[8], (1, H), dtype=jnp.float32),
    )

    out = grouped_attention(x, params, num_heads=NUM_HEADS,
                            num_kv_heads=NUM_KV_HEADS)
    out = jax.block_until_ready(out)

    ref = _reference(x, params, num_heads=NUM_HEADS, num_kv_heads=NUM_KV_HEADS)
    assert out.shape == (B, S, H)
    # bf16 MXU inputs with f32 accumulation -> tolerance loosened vs pure f32.
    assert jnp.allclose(out, ref, atol=1e-2, rtol=1e-2), "mismatch vs reference"

    print("KERNEL_OK")
</pallas_src>

<mosaic_0001>
module attributes {stable_mosaic.version = 11 : i64} {
  func.func @_gqa_kernel(%arg0: i32, %arg1: memref<1x8x32xf32, #tpu.memory_space<vmem>>, %arg2: memref<32x64xbf16, #tpu.memory_space<vmem>>, %arg3: memref<1x64xf32, #tpu.memory_space<vmem>>, %arg4: memref<32x32xbf16, #tpu.memory_space<vmem>>, %arg5: memref<1x32xf32, #tpu.memory_space<vmem>>, %arg6: memref<1x8x32xf32, #tpu.memory_space<vmem>>, %arg7: memref<8x32xbf16, #tpu.memory_space<vmem>>, %arg8: memref<16x8xf32, #tpu.memory_space<vmem>>, %arg9: memref<8x16xbf16, #tpu.memory_space<vmem>>, %arg10: memref<8x16xbf16, #tpu.memory_space<vmem>>) attributes {dimension_semantics = [#tpu.dimension_semantics<parallel>], iteration_bounds = array<i64: 2>, scalar_prefetch = 0 : i64, scratch_operands = 4 : i64, tpu.core_type = #tpu.core_type<tc>, window_params = [{transform_indices = @transform_0, window_bounds = array<i64: 1, 8, 32>}, {pipeline_mode = #tpu.pipeline_mode<synchronous>, transform_indices = @transform_1, window_bounds = array<i64: 32, 64>}, {pipeline_mode = #tpu.pipeline_mode<synchronous>, transform_indices = @transform_2, window_bounds = array<i64: 1, 64>}, {pipeline_mode = #tpu.pipeline_mode<synchronous>, transform_indices = @transform_3, window_bounds = array<i64: 32, 32>}, {pipeline_mode = #tpu.pipeline_mode<synchronous>, transform_indices = @transform_4, window_bounds = array<i64: 1, 32>}, {transform_indices = @transform_5, window_bounds = array<i64: 1, 8, 32>}]} {
    %c0 = arith.constant 0 : index
    %c0_0 = arith.constant 0 : index
    %c0_1 = arith.constant 0 : index
    %0 = vector.load %arg1[%c0, %c0_0, %c0_1] : memref<1x8x32xf32, #tpu.memory_space<vmem>>, vector<1x8x32xf32>
    %1 = vector.shape_cast %0 : vector<1x8x32xf32> to vector<8x32xf32>
    %2 = arith.truncf %1 : vector<8x32xf32> to vector<8x32xbf16>
    %c0_2 = arith.constant 0 : index
    %c0_3 = arith.constant 0 : index
    %3 = vector.load %arg2[%c0_2, %c0_3] : memref<32x64xbf16, #tpu.memory_space<vmem>>, vector<32x64xbf16>
    %cst = arith.constant dense<0.000000e+00> : vector<8x64xf32>
    %4 = tpu.matmul %2, %3, %cst {dimension_numbers = #tpu.dot_dimension_numbers<[1], [0], [0], [1], [0, 0, 1, 1], [], []>} : vector<8x32xbf16>, vector<32x64xbf16>, vector<8x64xf32> -> vector<8x64xf32>
    %c0_4 = arith.constant 0 : index
    %c0_5 = arith.constant 0 : index
    %5 = vector.load %arg3[%c0_4, %c0_5] : memref<1x64xf32, #tpu.memory_space<vmem>>, vector<1x64xf32>
    %6 = vector.broadcast %5 : vector<1x64xf32> to vector<8x64xf32>
    %7 = arith.addf %4, %6 : vector<8x64xf32>
    %8 = vector.extract_strided_slice %7 {offsets = [0, 0], sizes = [8, 32], strides = [1, 1]} : vector<8x64xf32> to vector<8x32xf32>
    %9 = vector.extract_strided_slice %7 {offsets = [0, 32], sizes = [8, 16], strides = [1, 1]} : vector<8x64xf32> to vector<8x16xf32>
    %10 = arith.truncf %9 : vector<8x16xf32> to vector<8x16xbf16>
    %c0_6 = arith.constant 0 : index
    %c0_7 = arith.constant 0 : index
    %11 = vector.load %arg9[%c0_6, %c0_7] : memref<8x16xbf16, #tpu.memory_space<vmem>>, vector<8x16xbf16>
    tpu.vector_store %arg9[%c0_6, %c0_7], %10 {strides = array<i32>} : memref<8x16xbf16, #tpu.memory_space<vmem>>, vector<8x16xbf16>,
    %12 = vector.extract_strided_slice %7 {offsets = [0, 48], sizes = [8, 16], strides = [1, 1]} : vector<8x64xf32> to vector<8x16xf32>
    %13 = arith.truncf %12 : vector<8x16xf32> to vector<8x16xbf16>
    %c0_8 = arith.constant 0 : index
    %c0_9 = arith.constant 0 : index
    %14 = vector.load %arg10[%c0_8, %c0_9] : memref<8x16xbf16, #tpu.memory_space<vmem>>, vector<8x16xbf16>
    tpu.vector_store %arg10[%c0_8, %c0_9], %13 {strides = array<i32>} : memref<8x16xbf16, #tpu.memory_space<vmem>>, vector<8x16xbf16>,
    %15 = tpu.iota {dimensions = array<i32: 1>} : vector<2x8x8xi32>
    %16 = vector.shape_cast %15 : vector<2x8x8xi32> to vector<16x8xi32>
    %17 = tpu.iota {dimensions = array<i32: 1>} : vector<16x8xi32>
    %18 = arith.cmpi sge, %16, %17 : vector<16x8xi32>
    %19 = vector.extract_strided_slice %8 {offsets = [0, 0], sizes = [8, 8], strides = [1, 1]} : vector<8x32xf32> to vector<8x8xf32>
    %c0_10 = arith.constant 0 : index
    %c0_11 = arith.constant 0 : index
    %20 = vector.load %arg8[%c0_10, %c0_11] : memref<16x8xf32, #tpu.memory_space<vmem>>, vector<8x8xf32>
    tpu.vector_store %arg8[%c0_10, %c0_11], %19 {strides = array<i32>} : memref<16x8xf32, #tpu.memory_space<vmem>>, vector<8x8xf32>,
    %21 = vector.extract_strided_slice %8 {offsets = [0, 8], sizes = [8, 8], strides = [1, 1]} : vector<8x32xf32> to vector<8x8xf32>
    %c8 = arith.constant 8 : index
    %c0_12 = arith.constant 0 : index
    %22 = vector.load %arg8[%c8, %c0_12] : memref<16x8xf32, #tpu.memory_space<vmem>>, vector<8x8xf32>
    tpu.vector_store %arg8[%c8, %c0_12], %21 {strides = array<i32>} : memref<16x8xf32, #tpu.memory_space<vmem>>, vector<8x8xf32>,
    %c0_13 = arith.constant 0 : index
    %c0_14 = arith.constant 0 : index
    %23 = vector.load %arg8[%c0_13, %c0_14] : memref<16x8xf32, #tpu.memory_space<vmem>>, vector<16x8xf32>
    %24 = arith.truncf %23 : vector<16x8xf32> to vector<16x8xbf16>
    %c0_15 = arith.constant 0 : index
    %c0_16 = arith.constant 0 : index
    %25 = vector.load %arg9[%c0_15, %c0_16] : memref<8x16xbf16, #tpu.memory_space<vmem>>, vector<8x8xbf16>
    %c0_17 = arith.constant 0 : index
    %c0_18 = arith.constant 0 : index
    %26 = vector.load %arg10[%c0_17, %c0_18] : memref<8x16xbf16, #tpu.memory_space<vmem>>, vector<8x8xbf16>
    %cst_19 = arith.constant dense<0.000000e+00> : vector<16x8xf32>
    %27 = tpu.matmul %24, %25, %cst_19 {dimension_numbers = #tpu.dot_dimension_numbers<[1], [1], [0], [0], [0, 0, 1, 0], [], []>} : vector<16x8xbf16>, vector<8x8xbf16>, vector<16x8xf32> -> vector<16x8xf32>
    %cst_20 = arith.constant -1.000000e+30 : f32
    %28 = vector.broadcast %cst_20 : f32 to vector<16x8xf32>
    %29 = arith.select %18, %27, %28 : vector<16x8xi1>, vector<16x8xf32>
    %cst_21 = arith.constant dense<0xFF800000> : vector<16xf32>
    %30 = vector.multi_reduction <maximumf>, %29, %cst_21 [1] : vector<16x8xf32> to vector<16xf32>
    %31 = vector.shape_cast %30 : vector<16xf32> to vector<16x1xf32>
    %32 = vector.broadcast %31 : vector<16x1xf32> to vector<16x8xf32>
    %33 = arith.subf %29, %32 : vector<16x8xf32>
    %34 = math.exp %33 : vector<16x8xf32>
    %cst_22 = arith.constant dense<0.000000e+00> : vector<16xf32>
    %35 = vector.multi_reduction <add>, %34, %cst_22 [1] : vector<16x8xf32> to vector<16xf32>
    %36 = vector.shape_cast %35 : vector<16xf32> to vector<16x1xf32>
    %37 = arith.truncf %34 : vector<16x8xf32> to vector<16x8xbf16>
    %cst_23 = arith.constant dense<0.000000e+00> : vector<16x8xf32>
    %38 = tpu.matmul %37, %26, %cst_23 {dimension_numbers = #tpu.dot_dimension_numbers<[1], [0], [0], [1], [0, 0, 1, 1], [], []>} : vector<16x8xbf16>, vector<8x8xbf16>, vector<16x8xf32> -> vector<16x8xf32>
    %39 = tpu.reciprocal %36 {approx = true} : vector<16x1xf32> -> vector<16x1xf32>
    %40 = vector.broadcast %39 : vector<16x1xf32> to vector<16x8xf32>
    %41 = arith.mulf %38, %40 : vector<16x8xf32>
    %42 = vector.extract_strided_slice %41 {offsets = [0, 0], sizes = [8, 8], strides = [1, 1]} : vector<16x8xf32> to vector<8x8xf32>
    %43 = arith.truncf %42 : vector<8x8xf32> to vector<8x8xbf16>
    %c0_24 = arith.constant 0 : index
    %c0_25 = arith.constant 0 : index
    %44 = vector.load %arg7[%c0_24, %c0_25] : memref<8x32xbf16, #tpu.memory_space<vmem>>, vector<8x8xbf16>
    tpu.vector_store %arg7[%c0_24, %c0_25], %43 {strides = array<i32>} : memref<8x32xbf16, #tpu.memory_space<vmem>>, vector<8x8xbf16>,
    %45 = vector.extract_strided_slice %41 {offsets = [8, 0], sizes = [8, 8], strides = [1, 1]} : vector<16x8xf32> to vector<8x8xf32>
    %46 = arith.truncf %45 : vector<8x8xf32> to vector<8x8xbf16>
    %c0_26 = arith.constant 0 : index
    %c8_27 = arith.constant 8 : index
    %47 = vector.load %arg7[%c0_26, %c8_27] : memref<8x32xbf16, #tpu.memory_space<vmem>>, vector<8x8xbf16>
    tpu.vector_store %arg7[%c0_26, %c8_27], %46 {strides = array<i32>} : memref<8x32xbf16, #tpu.memory_space<vmem>>, vector<8x8xbf16>,
    %48 = vector.extract_strided_slice %8 {offsets = [0, 16], sizes = [8, 8], strides = [1, 1]} : vector<8x32xf32> to vector<8x8xf32>
    %c0_28 = arith.constant 0 : index
    %c0_29 = arith.constant 0 : index
    %49 = vector.load %arg8[%c0_28, %c0_29] : memref<16x8xf32, #tpu.memory_space<vmem>>, vector<8x8xf32>
    tpu.vector_store %arg8[%c0_28, %c0_29], %48 {strides = array<i32>} : memref<16x8xf32, #tpu.memory_space<vmem>>, vector<8x8xf32>,
    %50 = vector.extract_strided_slice %8 {offsets = [0, 24], sizes = [8, 8], strides = [1, 1]} : vector<8x32xf32> to vector<8x8xf32>
    %c8_30 = arith.constant 8 : index
    %c0_31 = arith.constant 0 : index
    %51 = vector.load %arg8[%c8_30, %c0_31] : memref<16x8xf32, #tpu.memory_space<vmem>>, vector<8x8xf32>
    tpu.vector_store %arg8[%c8_30, %c0_31], %50 {strides = array<i32>} : memref<16x8xf32, #tpu.memory_space<vmem>>, vector<8x8xf32>,
    %c0_32 = arith.constant 0 : index
    %c0_33 = arith.constant 0 : index
    %52 = vector.load %arg8[%c0_32, %c0_33] : memref<16x8xf32, #tpu.memory_space<vmem>>, vector<16x8xf32>
    %53 = arith.truncf %52 : vector<16x8xf32> to vector<16x8xbf16>
    %c0_34 = arith.constant 0 : index
    %c8_35 = arith.constant 8 : index
    %54 = vector.load %arg9[%c0_34, %c8_35] : memref<8x16xbf16, #tpu.memory_space<vmem>>, vector<8x8xbf16>
    %c0_36 = arith.constant 0 : index
    %c8_37 = arith.constant 8 : index
    %55 = vector.load %arg10[%c0_36, %c8_37] : memref<8x16xbf16, #tpu.memory_space<vmem>>, vector<8x8xbf16>
    %cst_38 = arith.constant dense<0.000000e+00> : vector<16x8xf32>
    %56 = tpu.matmul %53, %54, %cst_38 {dimension_numbers = #tpu.dot_dimension_numbers<[1], [1], [0], [0], [0, 0, 1, 0], [], []>} : vector<16x8xbf16>, vector<8x8xbf16>, vector<16x8xf32> -> vector<16x8xf32>
    %cst_39 = arith.constant -1.000000e+30 : f32
    %57 = vector.broadcast %cst_39 : f32 to vector<16x8xf32>
    %58 = arith.select %18, %56, %57 : vector<16x8xi1>, vector<16x8xf32>
    %cst_40 = arith.constant dense<0xFF800000> : vector<16xf32>
    %59 = vector.multi_reduction <maximumf>, %58, %cst_40 [1] : vector<16x8xf32> to vector<16xf32>
    %60 = vector.shape_cast %59 : vector<16xf32> to vector<16x1xf32>
    %61 = vector.broadcast %60 : vector<16x1xf32> to vector<16x8xf32>
    %62 = arith.subf %58, %61 : vector<16x8xf32>
    %63 = math.exp %62 : vector<16x8xf32>
    %cst_41 = arith.constant dense<0.000000e+00> : vector<16xf32>
    %64 = vector.multi_reduction <add>, %63, %cst_41 [1] : vector<16x8xf32> to vector<16xf32>
    %65 = vector.shape_cast %64 : vector<16xf32> to vector<16x1xf32>
    %66 = arith.truncf %63 : vector<16x8xf32> to vector<16x8xbf16>
    %cst_42 = arith.constant dense<0.000000e+00> : vector<16x8xf32>
    %67 = tpu.matmul %66, %55, %cst_42 {dimension_numbers = #tpu.dot_dimension_numbers<[1], [0], [0], [1], [0, 0, 1, 1], [], []>} : vector<16x8xbf16>, vector<8x8xbf16>, vector<16x8xf32> -> vector<16x8xf32>
    %68 = tpu.reciprocal %65 {approx = true} : vector<16x1xf32> -> vector<16x1xf32>
    %69 = vector.broadcast %68 : vector<16x1xf32> to vector<16x8xf32>
    %70 = arith.mulf %67, %69 : vector<16x8xf32>
    %71 = vector.extract_strided_slice %70 {offsets = [0, 0], sizes = [8, 8], strides = [1, 1]} : vector<16x8xf32> to vector<8x8xf32>
    %72 = arith.truncf %71 : vector<8x8xf32> to vector<8x8xbf16>
    %c0_43 = arith.constant 0 : index
    %c16 = arith.constant 16 : index
    %73 = vector.load %arg7[%c0_43, %c16] : memref<8x32xbf16, #tpu.memory_space<vmem>>, vector<8x8xbf16>
    tpu.vector_store %arg7[%c0_43, %c16], %72 {strides = array<i32>} : memref<8x32xbf16, #tpu.memory_space<vmem>>, vector<8x8xbf16>,
    %74 = vector.extract_strided_slice %70 {offsets = [8, 0], sizes = [8, 8], strides = [1, 1]} : vector<16x8xf32> to vector<8x8xf32>
    %75 = arith.truncf %74 : vector<8x8xf32> to vector<8x8xbf16>
    %c0_44 = arith.constant 0 : index
    %c24 = arith.constant 24 : index
    %76 = vector.load %arg7[%c0_44, %c24] : memref<8x32xbf16, #tpu.memory_space<vmem>>, vector<8x8xbf16>
    tpu.vector_store %arg7[%c0_44, %c24], %75 {strides = array<i32>} : memref<8x32xbf16, #tpu.memory_space<vmem>>, vector<8x8xbf16>,
    %c0_45 = arith.constant 0 : index
    %c0_46 = arith.constant 0 : index
    %77 = vector.load %arg7[%c0_45, %c0_46] : memref<8x32xbf16, #tpu.memory_space<vmem>>, vector<8x32xbf16>
    %c0_47 = arith.constant 0 : index
    %c0_48 = arith.constant 0 : index
    %78 = vector.load %arg4[%c0_47, %c0_48] : memref<32x32xbf16, #tpu.memory_space<vmem>>, vector<32x32xbf16>
    %cst_49 = arith.constant dense<0.000000e+00> : vector<8x32xf32>
    %79 = tpu.matmul %77, %78, %cst_49 {dimension_numbers = #tpu.dot_dimension_numbers<[1], [0], [0], [1], [0, 0, 1, 1], [], []>} : vector<8x32xbf16>, vector<32x32xbf16>, vector<8x32xf32> -> vector<8x32xf32>
    %c0_50 = arith.constant 0 : index
    %c0_51 = arith.constant 0 : index
    %80 = vector.load %arg5[%c0_50, %c0_51] : memref<1x32xf32, #tpu.memory_space<vmem>>, vector<1x32xf32>
    %81 = vector.broadcast %80 : vector<1x32xf32> to vector<8x32xf32>
    %82 = arith.addf %79, %81 : vector<8x32xf32>
    %c0_52 = arith.constant 0 : index
    %c0_53 = arith.constant 0 : index
    %c0_54 = arith.constant 0 : index
    %83 = vector.load %arg6[%c0_52, %c0_53, %c0_54] : memref<1x8x32xf32, #tpu.memory_space<vmem>>, vector<1x8x32xf32>
    %84 = vector.shape_cast %83 : vector<1x8x32xf32> to vector<8x32xf32>
    %85 = vector.shape_cast %82 : vector<8x32xf32> to vector<1x8x32xf32>
    tpu.vector_store %arg6[%c0_52, %c0_53, %c0_54], %85 {strides = array<i32>} : memref<1x8x32xf32, #tpu.memory_space<vmem>>, vector<1x8x32xf32>,
    return
  }
  func.func @transform_0(%arg0: i32) -> (i32, i32, i32) {
    %c0_i32 = arith.constant 0 : i32
    %c0_i32_0 = arith.constant 0 : i32
    %c0_i32_1 = arith.constant 0 : i32
    return %arg0, %c0_i32, %c0_i32_0 : i32, i32, i32
  }
  func.func @transform_1(%arg0: i32) -> (i32, i32) {
    %c0_i32 = arith.constant 0 : i32
    %c0_i32_0 = arith.constant 0 : i32
    %c0_i32_1 = arith.constant 0 : i32
    return %c0_i32, %c0_i32_0 : i32, i32
  }
  func.func @transform_2(%arg0: i32) -> (i32, i32) {
    %c0_i32 = arith.constant 0 : i32
    %c0_i32_0 = arith.constant 0 : i32
    %c0_i32_1 = arith.constant 0 : i32
    return %c0_i32, %c0_i32_0 : i32, i32
  }
  func.func @transform_3(%arg0: i32) -> (i32, i32) {
    %c0_i32 = arith.constant 0 : i32
    %c0_i32_0 = arith.constant 0 : i32
    %c0_i32_1 = arith.constant 0 : i32
    return %c0_i32, %c0_i32_0 : i32, i32
  }
  func.func @transform_4(%arg0: i32) -> (i32, i32) {
    %c0_i32 = arith.constant 0 : i32
    %c0_i32_0 = arith.constant 0 : i32
    %c0_i32_1 = arith.constant 0 : i32
    return %c0_i32, %c0_i32_0 : i32, i32
  }
  func.func @transform_5(%arg0: i32) -> (i32, i32, i32) {
    %c0_i32 = arith.constant 0 : i32
    %c0_i32_0 = arith.constant 0 : i32
    %c0_i32_1 = arith.constant 0 : i32
    return %arg0, %c0_i32, %c0_i32_0 : i32, i32, i32
  }
}

</mosaic_0001>

<bundles_post_ra>
// kernel: tpu_custom_call.1
= control target key start
LH: loop header
LB: loop body
LE: loop exit
PB: predicated region body
PF: predicated region fallthrough
CT: control target
= control target key end

     0   :  { %10 = vsyncpa [#allocation7], 0  ;;  %s1694_s0 = inlined_call_operand.hbm [shape: f32[2,8,32], index: 0, kind: input, shape index: {}]   ;;  %s1695_s1 = inlined_call_operand.hbm [shape: bf16[32,64], index: 1, kind: input, shape index: {}]   ;;  %s1696_s2 = inlined_call_operand.hbm [shape: f32[1,64], index: 2, kind: input, shape index: {}]   ;;  %s1697_s3 = inlined_call_operand.hbm [shape: bf16[32,32], index: 3, kind: input, shape index: {}]   ;;  %s1698_s4 = inlined_call_operand.hbm [shape: f32[1,32], index: 4, kind: input, shape index: {}]   ;;  %s1699_s5 = inlined_call_operand.hbm [shape: f32[2,8,32], index: 5, kind: output, shape index: {}]  }
   0x1   :  { %12 = vsyncpa [#allocation7 + $0x1], 0 }
   0x2   :  { %13 = vsyncpa [#allocation10], 0 }
   0x3   :  { %14 = vsyncpa [#allocation13], 0 }
   0x4   :  { %15 = vsyncpa [#allocation8], 0 }
   0x5   :  { %17 = vsyncpa [#allocation8 + $0x1], 0  ;;  %s1359_s18 = smov 0   ;;  %s1361_s19 = smov 0  }
   0x6   :  { %s1363_s20 = smov 0   ;;  %s1365_s21 = smov 0  }
   0x7 LB: > { %s1311_s22 = smov [#allocation9]   ;;  %s1380_s24 = sadd.s32 4294967295, %s1309_s21   ;;  %s1309_s21 = sphi %s1365_s21, %s1723_s21   ;;  %s1305_s20 = sphi %s1363_s20, %s1722_s20   ;;  %s1301_s19 = sphi %s1361_s19, %s1721_s19   ;;  %s1297_s18 = sphi %s1359_s18, %s1720_s18  }
   0x8   : > { %s176_s23 = sshll.u32 %s1311_s22, 4  ;;  %p877_p0 = scmp.ge.s32.totalorder %s1309_s21, 1  ;;  %s1385_s23 = int_to_ptr.vmem [resolvable:$true] %s176_s23 }
   0x9   : > { %p1700_p1 = scmp.eq.s32.totalorder %s1380_s24, 0  ;;  %p164_p2 = scmp.lt.s32.totalorder %s1309_s21, 3 }
   0xa   : > { %s1312_s26 = smov [#allocation12]   ;;  %s1313_s29 = smov [#allocation11]  }
   0xb   : > { %p1387_p3 = pnand %p877_p0, %p164_p2  ;;  %s200_s27 = sshll.u32 %s1312_s26, 4  ;;  %s1400_s27 = int_to_ptr.vmem [resolvable:$true] %s200_s27 }
   0xc   : > { %s190_s30 = sshll.u32 %s1313_s29, 4  ;;  %s1093_s8 = scalar_lea.hbm %s1695_s1, 256  ;;  %s1402_s30 = int_to_ptr.vmem [resolvable:$true] %s190_s30 }
   0xd   : > { %s1703_s25 = scalar_select %p1387_p3, 1, 0 }
   0xe   : > { %p992_p5 = pneg %p1387_p3  ;;  %p1094_p7 = scmp.ne.s32.totalorder %s1695_s1, %s1093_s8 }
   0xf   : > { %p1100_p11 = scmp.lt.u32.totalorder %s1093_s8, %s1695_s1 }
  0x10   : > { %p1396_p6 = pnand %p992_p5, %p1700_p1 }
  0x12   : > { %p1412_p8 = pneg %p1396_p6 }
  0x14   : > { %p1096_p9 = pnand %p1412_p8, %p1094_p7 }
  0x16   : > { %p1097_p10 = pneg %p1096_p9 }
  0x18   : > { %p1102_p12 = pnand %p1100_p11, %p1097_p10 }
  0x1a   : > { %1105 = shalt.err (!%p1102_p12)
}
  0x1b   : > { %s1106_s14 = scalar_lea.vmem %s1385_s23, 256  ;;  %p1114_p5 = scmp.lt.s32.totalorder %s1385_s23, %s1385_s23 }
  0x1c   : > { %p1107_p13 = scmp.ne.s32.totalorder %s1385_s23, %s1106_s14  ;;  %p1115_p4 = scmp.lt.s32.totalorder %s1106_s14, %s1106_s14 }
  0x1e   : > { %p1109_p0 = pnand %p1107_p13, %p1412_p8  ;;  %p1116_p7 = por %p1115_p4, %p1114_p5 }
  0x20   : > { %p1110_p2 = pneg %p1109_p0 }
  0x22   : > { %p1117_p9 = pnand %p1116_p7, %p1110_p2 }
  0x24   : > { %1120 = shalt.err (!%p1117_p9)
}
  0x25   : > { %s1314_s15 = smov 64   ;;  %s1315_s16 = smov 4  }
  0x26   : > { %995 = dma.hbm_to_vmem [thread:$0]  (!%p1396_p6), %s1695_s1, 256, %s1385_s23, [#allocation10], %s1314_s15, %s1314_s15, %s1315_s16  }
  0x27   : > { %s1121_s6 = scalar_lea.hbm %s1697_s3, 256 }
  0x28   : > { %p1122_p4 = scmp.ne.s32.totalorder %s1697_s3, %s1121_s6  ;;  %p1128_p12 = scmp.lt.u32.totalorder %s1121_s6, %s1697_s3 }
  0x2a   : > { %p1124_p10 = pnand %p1122_p4, %p1412_p8 }
  0x2c   : > { %p1125_p11 = pneg %p1124_p10 }
  0x2e   : > { %p1130_p13 = pnand %p1128_p12, %p1125_p11 }
  0x30   : > { %1133 = shalt.err (!%p1130_p13)
}
  0x31   : > { %s1134_s23 = scalar_lea.vmem %s1400_s27, 256  ;;  %p1142_p7 = scmp.lt.s32.totalorder %s1400_s27, %s1400_s27 }
  0x32   : > { %p1135_p0 = scmp.ne.s32.totalorder %s1400_s27, %s1134_s23  ;;  %p1143_p9 = scmp.lt.s32.totalorder %s1134_s23, %s1134_s23 }
  0x34   : > { %p1137_p2 = pnand %p1135_p0, %p1412_p8  ;;  %p1144_p4 = por %p1143_p9, %p1142_p7 }
  0x36   : > { %p1138_p5 = pneg %p1137_p2 }
  0x38   : > { %p1145_p10 = pnand %p1144_p4, %p1138_p5 }
  0x3a   : > { %1148 = shalt.err (!%p1145_p10)
}
  0x3b   : > { %1001 = dma.hbm_to_vmem [thread:$0]  (!%p1396_p6), %s1697_s3, 256, %s1400_s27, [#allocation13], %s1314_s15, %s1314_s15, %s1315_s16  }
  0x3c   : > { %s1149_s22 = scalar_lea.hbm %s1696_s2, 16 }
  0x3d   : > { %p1150_p11 = scmp.ne.s32.totalorder %s1696_s2, %s1149_s22  ;;  %p1156_p0 = scmp.lt.u32.totalorder %s1149_s22, %s1696_s2 }
  0x3f   : > { %p1152_p12 = pnand %p1150_p11, %p1412_p8 }
  0x41   : > { %p1153_p13 = pneg %p1152_p12 }
  0x43   : > { %p1158_p2 = pnand %p1156_p0, %p1153_p13 }
  0x45   : > { %1161 = shalt.err (!%p1158_p2)
}
  0x46   : > { %s1162_s27 = scalar_lea.vmem %s1402_s30, 16  ;;  %s1169_s15 = scalar_lea.vmem %s1402_s30, 32 }
  0x47   : > { %p1163_p5 = scmp.ne.s32.totalorder %s1402_s30, %s1162_s27  ;;  %p1170_p4 = scmp.lt.s32.totalorder %s1402_s30, %s1402_s30 }
  0x48   : > { %p1171_p10 = scmp.lt.s32.totalorder %s1169_s15, %s1162_s27 }
  0x49   : > { %p1165_p7 = pnand %p1163_p5, %p1412_p8 }
  0x4a   : > { %p1172_p11 = por %p1171_p10, %p1170_p4 }
  0x4b   : > { %p1166_p9 = pneg %p1165_p7 }
  0x4d   : > { %p1173_p12 = pnand %p1172_p11, %p1166_p9 }
  0x4f   : > { %1176 = shalt.err (!%p1173_p12)
}
  0x50   : > { %998 = dma.hbm_to_vmem [thread:$0]  (!%p1396_p6), %s1696_s2, 16, %s1402_s30, [#allocation10]  }
  0x51   : > { %s1316_s9 = smov [#allocation14]   ;;  %s1177_s13 = scalar_lea.hbm %s1698_s4, 16 }
  0x52   : > { %s214_s10 = sshll.u32 %s1316_s9, 4  ;;  %p1178_p13 = scmp.ne.s32.totalorder %s1698_s4, %s1177_s13  ;;  %s215_s10 = int_to_ptr.vmem [resolvable:$true] %s214_s10 }
  0x53   : > { %p1184_p5 = scmp.lt.u32.totalorder %s1177_s13, %s1698_s4 }
  0x54   : > { %p1180_p0 = pnand %p1178_p13, %p1412_p8 }
  0x56   : > { %p1181_p2 = pneg %p1180_p0 }
  0x58   : > { %p1186_p7 = pnand %p1184_p5, %p1181_p2 }
  0x5a   : > { %1189 = shalt.err (!%p1186_p7)
}
  0x5b   : > { %s1190_s30 = scalar_lea.vmem %s215_s10, 16  ;;  %s1197_s29 = scalar_lea.vmem %s215_s10, 32 }
  0x5c   : > { %p1191_p9 = scmp.ne.s32.totalorder %s215_s10, %s1190_s30  ;;  %p1198_p11 = scmp.lt.s32.totalorder %s215_s10, %s215_s10 }
  0x5d   : > { %p1199_p12 = scmp.lt.s32.totalorder %s1197_s29, %s1190_s30 }
  0x5e   : > { %p1193_p4 = pnand %p1191_p9, %p1412_p8 }
  0x5f   : > { %p1200_p1 = por %p1199_p12, %p1198_p11 }
  0x60   : > { %p1194_p10 = pneg %p1193_p4 }
  0x62   : > { %p1201_p3 = pnand %p1200_p1, %p1194_p10 }
  0x64   : > { %1204 = shalt.err (!%p1201_p3)
}
  0x65   : > { %1004 = dma.hbm_to_vmem [thread:$0]  (!%p1396_p6), %s1698_s4, 16, %s215_s10, [#allocation13]  }
  0x66   : > { %s876_s11 = sadd.s32 4294967294, %s1309_s21   ;;  %s1500_s28 = sadd.s32 1, %s1309_s21  }
  0x67   : > { %s27_s27 = ssub.s32 %s1309_s21, %s1500_s28  ;;  %s30_s15 = sadd.s32 1, %s1305_s20 }
  0x68   : > { %p28_p1 = scmp.eq.s32.totalorder %s27_s27, 0  ;;  %p37_p3 = scmp.ne.s32.totalorder %s1305_s20, %s1301_s19 }
  0x69   : > { %p38_p8 = scmp.eq.s32.totalorder %s1309_s21, 0  ;;  %p43_p13 = scmp.ne.s32.totalorder %s1301_s19, %s1297_s18 }
  0x6a   : > { %s1511_s16 = scalar_select %p28_p1, %s1305_s20, %s30_s15  }
  0x6b   : > { %p1513_p0 = por %p38_p8, %p37_p3  ;;  %p1707_p2 = scmp.eq.s32.totalorder %s1380_s24, 0 }
  0x6c   : > { %p151_p5 = scmp.eq.s32.totalorder %s1380_s24, 1  ;;  %p157_p7 = scmp.eq.s32.totalorder %s876_s11, 1 }
  0x6d   : > { %p1519_p6 = por %p1707_p2, %p43_p13  ;;  %p1017_p9 = scmp.lt.s32.totalorder %s1309_s21, 2 }
  0x6e   : > { %s225_s10 = sand.u32 1, %s1305_s20   ;;  %p1526_p4 = por %p151_p5, %p37_p3 }
  0x6f   : > { %p1530_p10 = por %p157_p7, %p43_p13  ;;  %s883_s13 = sshll.u32 %s225_s10, 3 }
  0x70   : > { %s1709_s23 = scalar_select %p1526_p4, 1, 0 }
  0x71   : > { %s1710_s12 = scalar_select %p1530_p10, 1, 0 }
  0x72   : > { %s884_s14 = sshll.u32 %s1309_s21, 7  ;;  %s229_s30 = scalar_lea.vmem [#allocation6], %s883_s13 }
  0x73   : > { %s1538_s26 = scalar_lea.hbm %s1694_s0, %s884_s14  ;;  %s236_s29 = sshll.u32 %s229_s30, 4  ;;  %s1540_s29 = int_to_ptr.vmem [resolvable:$true] %s236_s29 }
  0x74   : > { %p1544_p11 = pnand %p1017_p9, %p1513_p0  ;;  %s226_s7 = scalar_lea.sflag [#allocation7], %s225_s10 }
  0x75   : > { %s1205_s11 = scalar_lea.hbm %s1538_s26, 128  ;;  %s1210_s13 = scalar_lea.hbm %s1694_s0, 256 }
  0x76   : > { %p1206_p12 = scmp.ne.s32.totalorder %s1538_s26, %s1205_s11  ;;  %p1207_p1 = pneg %p1544_p11 }
  0x77   : > { %p1211_p13 = scmp.lt.u32.totalorder %s1538_s26, %s1694_s0  ;;  %p1212_p0 = scmp.lt.u32.totalorder %s1210_s13, %s1205_s11 }
  0x78   : > { %p1208_p3 = pnand %p1207_p1, %p1206_p12  ;;  %p1214_p5 = scmp.lt.u32.totalorder %s1205_s11, %s1538_s26 }
  0x79   : > { %p1213_p2 = por %p1212_p0, %p1211_p13 }
  0x7a   : > { %p1209_p8 = pneg %p1208_p3 }
  0x7b   : > { %p1215_p7 = por %p1214_p5, %p1213_p2 }
  0x7d   : > { %p1216_p9 = pnand %p1215_p7, %p1209_p8 }
  0x7f   : > { %1219 = shalt.err (!%p1216_p9)
}
  0x80   : > { %s1220_s10 = scalar_lea.vmem %s1540_s29, 128  ;;  %s1317_s17 = smov [#allocation6]  }
  0x81   : > { %p1221_p12 = scmp.ne.s32.totalorder %s1540_s29, %s1220_s10  ;;  %s1225_s22 = sshll.u32 %s1317_s17, 4  ;;  %s1226_s22 = int_to_ptr.vmem [resolvable:$false] %s1225_s22 }
  0x82   : > { %s1227_s30 = scalar_lea.vmem %s1226_s22, 256  ;;  %p1228_p4 = scmp.lt.s32.totalorder %s1540_s29, %s1226_s22 }
  0x83   : > { %p1223_p3 = pnand %p1221_p12, %p1207_p1  ;;  %p1229_p13 = scmp.lt.s32.totalorder %s1227_s30, %s1220_s10 }
  0x85   : > { %p1224_p10 = pneg %p1223_p3  ;;  %p1230_p0 = por %p1229_p13, %p1228_p4 }
  0x87   : > { %p1231_p2 = pnand %p1230_p0, %p1224_p10 }
  0x89   : > { %1234 = shalt.err (!%p1231_p2)
}
  0x8a   : > { %1008 = dma.hbm_to_vmem [thread:$0]  (!%p1544_p11), %s1538_s26, 128, %s1540_s29, %s226_s7  }
  0x8b   : > { %p1712_p8 = scmp.ne.s32.totalorder %s1703_s25, 0 }
  0x8c   : > { %s1576_s11 = sand.u32 (!%p1712_p8), 1, %s1301_s19  }
  0x8d   : > { %245 = sbr.rel (%p1712_p8) target bundleno = 1574 (0x626), region = 40  ;;  %s886_s27 = sshll.u32 (!%p1712_p8), %s1576_s11, 3 }
  0x8e   : > { %s248_s15 = scalar_lea.sflag (!%p1712_p8), [#allocation7], %s1576_s11  ;;  %s251_s13 = scalar_lea.vmem (!%p1712_p8), [#allocation6], %s886_s27 }
  0x94   : > { %1280 = dma.done.wait (%p1519_p6), %s248_s15, 128  }
  0x95   : > { %1282 = vsyncadd (%p1519_p6), %s248_s15, 4294967168  ;;  %p1713_p4 = scmp.eq.s32.totalorder %s1380_s24, 0 }
  0x97   : > { %1284 = dma.done.wait (%p1713_p4), [#allocation10], 272   ;;  %p1714_p10 = pmov %p1713_p4 }
  0x98   : > { %p1715_p11 = pmov %p1713_p4 }
  0x99   : > { %1286 = vsyncadd (%p1714_p10), [#allocation10], 4294967024 }
  0x9a   : > { %1288 = dma.done.wait (%p1715_p11), [#allocation13], 272   ;;  %p1716_p1 = pmov %p1713_p4 }
  0x9b   : > { %v1318_v0 = vmov 0.0   ;;  %vm1319_vm0 = vmmov 0   ;;  %v1071_v1 = vld [vmem:[#allocation9] sm:$0xff]   ;;  %v1072_v2 = vld [vmem:[#allocation9 + $0x8] sm:$0xff]   ;;  %v295_v3 = vld [vmem:[%s251_s13] sm:$0xff]  ;;  %vm320_vm1 = vcmask 261120   ;;  %v377_v30 = vlaneseq }
  0x9c   : > { %1290 = vsyncadd (%p1716_p1), [#allocation13], 4294967024  ;;  %932 = vmatprep.subr.bf16.mxu0 %v1318_v0  ;;  %936 = vmatprep.mubr.msk.bf16.mxu0 %vm1319_vm0, %v1318_v0  ;;  %v296_v4 = vpack.c.bf16 %v295_v3, %v295_v3  ;;  %v892_v5 = vld [vmem:[#allocation11] ss:$0 sm:$0xff]  ;;  %vm382_vm2 = vcmask 64512   ;;  %s1320_s25 = smov 112  }
  0x9d   : > { %940 = vmatprep.subr.bf16.mxu1 %v1318_v0  ;;  %942 = vmatprep.mubr.msk.bf16.mxu1 %vm1319_vm0, %v1318_v0  ;;  %s1321_s9 = smov 96   ;;  %s1322_s26 = smov 104   ;;  %vm371_vm3 = vcmask 125952   ;;  %vm465_vm4 = vcmask 1043456   ;;  %v378_v31 = vshrl.u32 %v377_v30, 7  ;;  %v380_v32 = vand.u32 127, %v377_v30 }
  0x9e   : > { %933 = vmatpush3.bf16.msra.mxu0 %v1071_v1  ;;  %s1323_s29 = smov 120   ;;  %s1324_s6 = smov 80   ;;  %vm515_vm6 = vcmask 60416   ;;  %vm524_vm7 = vcmask 126016   ;;  %vm675_vm8 = vcmask 191616   ;;  %vm684_vm9 = vcmask 257216  }
  0x9f   : > { %934 = vmatprep.subr.bf16.mxu0 %v1318_v0  ;;  %vm381_vm5 = vcmp.ge.s32.totalorder %v378_v31, %v380_v32  ;;  %s1325_s7 = smov 8   ;;  %s1326_s8 = smov 16  }
  0xa0   : > { %s1327_s14 = smov 24   ;;  %s911_s10 = sshll.u32 %s1380_s24, 7 }
  0xa1   : > { %s293_s17 = scalar_lea.vmem [#allocation15], %s886_s27  ;;  %s1649_s13 = scalar_lea.hbm %s1699_s5, %s911_s10 }
  0xa2   : > { %935 = vmatpush3.bf16.msra.mxu0 %v1072_v2  ;;  %s768_s22 = sshll.u32 %s293_s17, 4  ;;  %s755_s24 = scalar_lea.sflag [#allocation8], %s1576_s11  ;;  %s1651_s22 = int_to_ptr.vmem [resolvable:$true] %s768_s22 }
  0xa3   : > { %946 = vmatprep.subr.bf16.mxu0 %v1318_v0  ;;  %s1235_s27 = scalar_lea.vmem %s1651_s22, 128  ;;  %p1717_p5 = scmp.ne.s32.totalorder %s1709_s23, 0 }
  0xa4   : > { %p1236_p6 = scmp.ne.s32.totalorder %s1651_s22, %s1235_s27 }
  0xa5   : > { %937 = vmatmul.mubr.msk.bf16.vlgmr.msra.gmra.mrb[0].mxu0 %vm320_vm1, %v296_v4 }
  0xa6   : > { %948 = vmatprep.mubr.msk.bf16.mxu0 %vm1319_vm0, %v1318_v0  ;;  %p1237_p7 = pnand %p1236_p6, %p1717_p5 }
  0xa8   : > { %p1238_p9 = pneg %p1237_p7 }
 0x178   : > { %v358_v6 = vpop.f32.mrb[0].mxu0 }
 0x179   : > { %v359_v7 = vadd.f32 %v892_v5, %v358_v6  ;;  %v938_v8 = vpop.f32.mrb[1].mxu0 }
 0x17a   : > { %v361_v9 = vpop.f32.mrb[2].mxu0 }
 0x17b   : > { %526 = vrot.lane.b32.xlu1 %v359_v7, %s1320_s25  ;;  %v939_v10 = vpop.f32.mrb[3].mxu0  ;;  %v914_v11 = vpack.c.bf16 %v359_v7, %v359_v7  ;;  %383 = vst.msk [vmem:[#allocation3] sm:$0xff] %vm382_vm2, %v359_v7  ;;  %s1328_s25 = smov [#allocation15]  }
 0x17d   : > { %368 = vrot.lane.b32.xlu0 %v914_v11, %s1321_s9  ;;  %s1239_s9 = sshll.u32 %s1328_s25, 4  ;;  %s1240_s9 = int_to_ptr.vmem [resolvable:$false] %s1239_s9 }
 0x17e   : > { %p1242_p12 = scmp.lt.s32.totalorder %s1651_s22, %s1240_s9 }
 0x17f   : > { %530 = vrot.lane.b32.xlu1 %v359_v7, %s1322_s26  ;;  %s1241_s26 = scalar_lea.vmem %s1240_s9, 256 }
 0x180   : > { %p1243_p3 = scmp.lt.s32.totalorder %s1241_s26, %s1235_s27 }
 0x181   : > { %385 = vrot.lane.b32.xlu0 %v359_v7, %s1323_s29 }
 0x182   : > { %v389_v13 = vld [vmem:[#allocation3] sm:$0xff]  ;;  %p1244_p13 = por %p1243_p3, %p1242_p12 }
 0x183   : > { %373 = vrot.lane.b32.xlu1 %v914_v11, %s1324_s6 }
 0x184   : > { %p1245_p0 = pnand %p1244_p13, %p1238_p9 }
 0x1ed   : > { %v527_v12 = vpop.permute.xlu1 %526 }
 0x1ee   : > { %529 = vst.msk [vmem:[#allocation3] sm:$0xff] %vm382_vm2, %v527_v12 }
 0x1ef   : > { %v369_v14 = vpop.permute.xlu0 %368 }
 0x1f0   : > { %372 = vst.msk [vmem:[#allocation4] sm:$0xf] %vm371_vm3, %v369_v14 }
 0x1f1   : > { %v531_v15 = vpop.permute.xlu1 %530 }
 0x1f3   : > { %v386_v16 = vpop.permute.xlu0 %385 }
 0x1f4   : > { %388 = vst.msk [vmem:[#allocation3 + $0x8] sm:$0xff] %vm382_vm2, %v386_v16 }
 0x1f5   : > { %v374_v17 = vpop.permute.xlu1 %373  ;;  %v534_v28 = vld [vmem:[#allocation3] sm:$0xff] }
 0x1f6   : > { %376 = vst.msk [vmem:[#allocation5] sm:$0xf] %vm371_vm3, %v374_v17 }
 0x1f7   : > { %v392_v18 = vld [vmem:[#allocation4] sm:$0xf] }
 0x1f8   : > { %v1073_v19 = vld [vmem:[#allocation4] ss:$0 sps:$4 sm:$0xff]   ;;  %v398_v20 = vsel %vm382_vm2, %v392_v18, 0 }
 0x1f9   : > { %941 = vmatpush3.bf16.xpose.msra.mxu1 %v398_v20  ;;  %542 = vrot.lane.b32.xlu0 %v1073_v19, %s1323_s29 }
 0x1fa   : > { %952 = vmatprep.subr.bf16.mxu1 %v1318_v0 }
 0x1fb   : > { %v390_v21 = vld [vmem:[#allocation3 + $0x8] sm:$0xff] }
 0x1fc   : > { %533 = vst.msk [vmem:[#allocation3 + $0x8] sm:$0xff] %vm382_vm2, %v531_v15  ;;  %v391_v24 = vpack.c.bf16 %v390_v21, %v389_v13 }
 0x1fd   : > { %v393_v22 = vld [vmem:[#allocation5] sm:$0xf] }
 0x1fe   : > { %v467_v23 = vsel %vm465_vm4, %v393_v22, 0  ;;  %v1074_v41 = vld [vmem:[#allocation5] ss:$0 sps:$4 sm:$0xff]  }
 0x1ff   : > { %947 = vmatpush3.bf16.msra.mxu0 %v467_v23 }
 0x200   : > { %943 = vmatmul.mubr.msk.bf16.vlgmr.msra.gmra.mrb[0].mxu1 %vm382_vm2, %v391_v24  ;;  %958 = vmatprep.subr.bf16.mxu0 %v1318_v0 }
 0x201   : > { %954 = vmatprep.mubr.msk.bf16.mxu1 %vm1319_vm0, %v1318_v0 }
 0x203   : > { %v535_v27 = vld [vmem:[#allocation3 + $0x8] sm:$0xff] }
 0x204   : > { %v536_v29 = vpack.c.bf16 %v535_v27, %v534_v28 }
 0x26b   : > { %v543_v25 = vpop.permute.xlu0 %542 }
 0x26c   : > { %v548_v26 = vsel %vm382_vm2, %v543_v25, 0  ;;  %v1075_v25 = vld [vmem:[#allocation12] sm:$0xff]  }
 0x26d   : > { %953 = vmatpush3.bf16.xpose.msra.mxu1 %v548_v26  ;;  %v1076_v26 = vld [vmem:[#allocation12 + $0x8] sm:$0xff]  }
 0x26e   : > { %964 = vmatprep.subr.bf16.mxu1 %v1318_v0 }
 0x274   : > { %955 = vmatmul.mubr.msk.bf16.vlgmr.msra.gmra.mrb[4].mxu1 %vm382_vm2, %v536_v29 }
 0x275   : > { %968 = vmatprep.mubr.msk.bf16.mxu1 %vm1319_vm0, %v1318_v0  ;;  %965 = vmatpush3.bf16.msra.mxu1 %v1075_v25 }
 0x276   : > { %966 = vmatprep.subr.bf16.mxu1 %v1318_v0 }
 0x279   : > { %967 = vmatpush3.bf16.msra.mxu1 %v1076_v26 }
 0x2d3   : > { %v434_v33 = vpop.f32.mrb[0].mxu1 }
 0x2d4   : > { %v441_v34 = vsel %vm381_vm5, %v434_v33, -1e+30  ;;  %v944_v35 = vpop.f32.mrb[1].mxu1 }
 0x2d5   : > { %v437_v36 = vpop.f32.mrb[2].mxu1  ;;  %v443_v37 = vsel %vm382_vm2, %v441_v34, -inf }
 0x2d6   : > { %v442_v38 = vsel %vm381_vm5, %v437_v36, -1e+30  ;;  %444 = vmax.xlane.f32.xlu0 %v443_v37  ;;  %v945_v39 = vpop.f32.mrb[3].mxu1 }
 0x2d7   : > { %v446_v40 = vsel %vm382_vm2, %v442_v38, -inf }
 0x2d8   : > { %447 = vmax.xlane.f32.xlu1 %v446_v40  ;;  %v906_v40 = vld [vmem:[#allocation14] ss:$0 sm:$0xff] }
 0x2e9   : > { %615 = vrot.lane.b32.xlu1 %v1074_v41, %s1323_s29 }
 0x347   : > { %v584_v42 = vpop.f32.mrb[4].mxu1 }
 0x348   : > { %v591_v43 = vsel %vm381_vm5, %v584_v42, -1e+30  ;;  %v956_v44 = vpop.f32.mrb[5].mxu1 }
 0x349   : > { %v587_v45 = vpop.f32.mrb[6].mxu1  ;;  %v593_v46 = vsel %vm382_vm2, %v591_v43, -inf }
 0x34a   : > { %v592_v47 = vsel %vm381_vm5, %v587_v45, -1e+30  ;;  %594 = vmax.xlane.f32.xlu0 %v593_v46  ;;  %v957_v48 = vpop.f32.mrb[7].mxu1 }
 0x34b   : > { %v596_v49 = vsel %vm382_vm2, %v592_v47, -inf }
 0x34e   : > { %597 = vmax.xlane.f32.xlu0 %v596_v49 }
 0x363   : > { %v445_v50 = vpop.xlane.xlu0 %444 }
 0x364   : > { %v449_v51 = vsub.f32 %v441_v34, %v445_v50 }
 0x365   : > { %v448_v52 = vpop.xlane.xlu1 %447 }
 0x366   : > { %v451_v53 = vmul.f32 1.442695, %v449_v51  ;;  %v450_v54 = vsub.f32 %v442_v38, %v448_v52 }
 0x368   : > { %v453_v55 = vmul.f32 1.442695, %v450_v54  ;;  %1077 = vpow2.f32 %v451_v53 }
 0x369   : > { %v616_v58 = vpop.permute.xlu1 %615 }
 0x36a   : > { %1079 = vpow2.f32 %v453_v55  ;;  %v621_v61 = vsel %vm465_vm4, %v616_v58, 0 }
 0x372   : > { %v1078_v56 = vpop.eup %1077 }
 0x373   : > { %v455_v10 = vsel %vm382_vm2, %v1078_v56, 0.0 }
 0x374   : > { %v1080_v57 = vpop.eup %1079 }
 0x375   : > { %v458_v59 = vsel %vm382_vm2, %v1080_v57, 0.0  ;;  %v461_v60 = vpack.c.bf16 %v1080_v57, %v1078_v56 }
 0x376   : > { %459 = vadd.xlane.f32.xlu0 %v458_v59 }
 0x377   : > { %949 = vmatmul.mubr.msk.bf16.vlgmr.msra.gmra.mrb[4].mxu0 %vm382_vm2, %v461_v60 }
 0x378   : > { %959 = vmatpush3.bf16.msra.mxu0 %v621_v61  ;;  %960 = vmatprep.mubr.msk.bf16.mxu0 %vm1319_vm0, %v1318_v0 }
 0x3d7   : > { %v595_v62 = vpop.xlane.xlu0 %594 }
 0x3d8   : > { %v599_v63 = vsub.f32 %v591_v43, %v595_v62 }
 0x3da   : > { %v601_v1 = vmul.f32 1.442695, %v599_v63 }
 0x3db   : > { %v598_v2 = vpop.xlane.xlu0 %597 }
 0x3dc   : > { %1081 = vpow2.f32 %v601_v1  ;;  %v600_v3 = vsub.f32 %v592_v47, %v598_v2 }
 0x3de   : > { %v603_v4 = vmul.f32 1.442695, %v600_v3 }
 0x3e0   : > { %1083 = vpow2.f32 %v603_v4 }
 0x3e6   : > { %v1082_v5 = vpop.eup %1081 }
 0x3e7   : > { %v605_v6 = vsel %vm382_vm2, %v1082_v5, 0.0 }
 0x3e8   : > { %606 = vadd.xlane.f32.xlu0 %v605_v6 }
 0x3ea   : > { %v1084_v7 = vpop.eup %1083 }
 0x3eb   : > { %v608_v8 = vsel %vm382_vm2, %v1084_v7, 0.0  ;;  %v611_v9 = vpack.c.bf16 %v1084_v7, %v1082_v5 }
 0x3ec   : > { %609 = vadd.xlane.f32.xlu0 %v608_v8 }
 0x3ed   : > { %961 = vmatmul.mubr.msk.bf16.vlgmr.msra.gmra.mrb[8].mxu0 %vm382_vm2, %v611_v9 }
 0x3f0   : > { %456 = vadd.xlane.f32.xlu0 %v455_v10 }
 0x403   : > { %v460_v11 = vpop.xlane.xlu0 %459 }
 0x404   : > { %1085 = vrcp.f32 %v460_v11 }
 0x40e   : > { %v1086_v14 = vpop.eup %1085 }
 0x44a   : > { %v503_v12 = vpop.f32.mrb[4].mxu0 }
 0x44b   : > { %v950_v13 = vpop.f32.mrb[5].mxu0 }
 0x44c   : > { %v506_v15 = vpop.f32.mrb[6].mxu0 }
 0x44d   : > { %v513_v16 = vmul.f32 %v1086_v14, %v506_v15  ;;  %v951_v17 = vpop.f32.mrb[7].mxu0 }
 0x44f   : > { %v915_v18 = vpack.c.bf16 %v513_v16, %v513_v16 }
 0x451   : > { %521 = vrot.lane.b32.xlu1 %v915_v18, %s1325_s7 }
 0x475   : > { %v607_v19 = vpop.xlane.xlu0 %606 }
 0x479   : > { %v610_v20 = vpop.xlane.xlu0 %609 }
 0x47d   : > { %v457_v21 = vpop.xlane.xlu0 %456 }
 0x47e   : > { %1087 = vrcp.f32 %v457_v21 }
 0x47f   : > { %1089 = vrcp.f32 %v607_v19 }
 0x480   : > { %1091 = vrcp.f32 %v610_v20 }
 0x488   : > { %v1088_v22 = vpop.eup %1087 }
 0x489   : > { %v512_v23 = vmul.f32 %v1088_v22, %v503_v12  ;;  %v1090_v27 = vpop.eup %1089 }
 0x48a   : > { %v1092_v31 = vpop.eup %1091 }
 0x48b   : > { %v514_v24 = vpack.c.bf16 %v512_v23, %v512_v23 }
 0x48d   : > { %516 = vst.msk [vmem:[#allocation2] sm:$0xf] %vm515_vm6, %v514_v24 }
 0x4c0   : > { %v657_v28 = vpop.f32.mrb[8].mxu0 }
 0x4c1   : > { %v666_v29 = vmul.f32 %v1090_v27, %v657_v28  ;;  %v962_v30 = vpop.f32.mrb[9].mxu0 }
 0x4c2   : > { %v660_v32 = vpop.f32.mrb[10].mxu0 }
 0x4c3   : > { %v916_v33 = vpack.c.bf16 %v666_v29, %v666_v29  ;;  %v522_v34 = vpop.permute.xlu1 %521  ;;  %v667_v35 = vmul.f32 %v1092_v31, %v660_v32  ;;  %v963_v36 = vpop.f32.mrb[11].mxu0 }
 0x4c4   : > { %525 = vst.msk [vmem:[#allocation2] sm:$0xf] %vm524_vm7, %v522_v34 }
 0x4c5   : > { %v917_v37 = vpack.c.bf16 %v667_v35, %v667_v35  ;;  %672 = vrot.lane.b32.xlu0 %v916_v33, %s1326_s8 }
 0x4c7   : > { %681 = vrot.lane.b32.xlu1 %v917_v37, %s1327_s14 }
 0x537   : > { %v673_v0 = vpop.permute.xlu0 %672 }
 0x538   : > { %676 = vst.msk [vmem:[#allocation2] sm:$0xf] %vm675_vm8, %v673_v0 }
 0x539   : > { %v682_v38 = vpop.permute.xlu1 %681 }
 0x53a   : > { %685 = vst.msk [vmem:[#allocation2] sm:$0xf] %vm684_vm9, %v682_v38 }
 0x541   : > { %v686_v39 = vld [vmem:[#allocation2] sm:$0xf] }
 0x542   : > { %969 = vmatmul.mubr.msk.bf16.vlgmr.msra.gmra.mrb[8].mxu1 %vm320_vm1, %v686_v39 }
 0x615   : > { %v747_v41 = vpop.f32.mrb[8].mxu1 }
 0x616   : > { %v748_v42 = vadd.f32 %v906_v40, %v747_v41  ;;  %v970_v43 = vpop.f32.mrb[9].mxu1 }
 0x617   : > { %v750_v44 = vpop.f32.mrb[10].mxu1 }
 0x618   : > { %v971_v45 = vpop.f32.mrb[11].mxu1  ;;  %753 = vst.msk [vmem:[%s293_s17] sm:$0xff] %vm320_vm1, %v748_v42 }
 0x619   : > { %1248 = shalt.err (!%p1245_p0)
}
 0x61a   : > { %s1249_s11 = scalar_lea.hbm %s1649_s13, 128  ;;  %s1253_s7 = scalar_lea.hbm %s1699_s5, 256 }
 0x61b   : > { %p1250_p2 = scmp.ne.s32.totalorder %s1649_s13, %s1249_s11  ;;  %p1254_p10 = scmp.lt.u32.totalorder %s1649_s13, %s1699_s5 }
 0x61c   : > { %p1255_p11 = scmp.lt.u32.totalorder %s1253_s7, %s1249_s11  ;;  %p1257_p6 = scmp.lt.u32.totalorder %s1249_s11, %s1649_s13 }
 0x61d   : > { %p1251_p8 = pnand %p1250_p2, %p1717_p5 }
 0x61e   : > { %p1256_p1 = por %p1255_p11, %p1254_p10 }
 0x61f   : > { %p1252_p4 = pneg %p1251_p8 }
 0x620   : > { %p1258_p7 = por %p1257_p6, %p1256_p1 }
 0x622   : > { %p1259_p9 = pnand %p1258_p7, %p1252_p4 }
 0x624   : > { %1262 = shalt.err (!%p1259_p9)
}
 0x625   : > { %990 = dma.vmem_to_hbm [thread:$0]  (%p1717_p5), %s1651_s22, 128, %s1649_s13, %s755_s24  }
 0x626 PF: > { %s780_s10 = sand.u32 1, %s1297_s18   ;;  %p1718_p12 = scmp.ne.s32.totalorder %s1710_s12, 0 }
 0x627   : > { %p1719_p3 = scmp.ge.s32.totalorder %s1309_s21, 2  ;;  %s781_s17 = scalar_lea.sflag [#allocation8], %s780_s10 }
 0x629   : > { %p1010_p13 = pnand %p1719_p3, %p1718_p12 }
 0x62b   : > { %1292 = dma.done.wait (!%p1010_p13), %s781_s17, 128  }
 0x62c   : > { %1294 = vsyncadd (!%p1010_p13), %s781_s17, 4294967168  ;;  %p20_p0 = scmp.ge.s32.totalorder %s1500_s28, 4   ;;  %s1720_s18 = smov %s1301_s19 }
 0x62d   : > { %s1721_s19 = smov %s1305_s20  ;;  %s1722_s20 = smov %s1511_s16 }
 0x62e   : > { %s1723_s21 = smov %s1500_s28  ;;  %22 = sbr.rel (!%p20_p0) target bundleno = 7 (0x7), region = 101 }
 0x635   :  { %786 = vsyncpa [#allocation7], 1 }
 0x636   :  { %788 = vsyncpa [#allocation7 + $0x1], 1 }
 0x637   :  { %789 = vsyncpa [#allocation10], 1 }
 0x638   :  { %790 = vsyncpa [#allocation13], 1 }
 0x639   :  { %791 = vsyncpa [#allocation8], 1 }
 0x63a   :  { %793 = vsyncpa [#allocation8 + $0x1], 1 }

</bundles_post_ra>
